<compile_context>
chip_gen: v7x
topology: tpu7x:2x2x1
jax: 0.10.0
libtpu: 0.0.40
codegen_flags: <defaults>
</compile_context>

<pallas_src>
import jax
import jax.numpy as jnp
from jax import lax
from jax.experimental import pallas as pl
from jax.experimental.pallas import tpu as pltpu

NEG_SLOPE = 0.1
BN_EPS = 1e-5


def _fold_bn(gamma, beta, mean, var, eps=BN_EPS):
    scale = gamma / jnp.sqrt(var + eps)
    bias = beta - mean * scale
    return scale, bias


def _pick_batch_block(n, max_nb=8):
    """Largest divisor of n (<= max_nb) that still leaves >=2 grid steps (keeps both
    v7x TensorCores busy); otherwise take the whole batch in one step."""
    divisors = [d for d in range(1, min(n, max_nb) + 1) if n % d == 0]
    multi = [d for d in divisors if n // d >= 2]
    return max(multi) if multi else max(divisors)


def _make_cnn_block_kernel(W, L, slope):
    """Kernel over one lane-flattened batch block of L = Nb*H*W pixels."""

    def leaky(v):
        # slope in (0,1) => LeakyReLU == max(v, slope*v): single VPU op.
        return jnp.maximum(v, slope * v)

    def kernel(x_ref, w1_ref, b1_ref, w2_ref, b2_ref, w3_ref, b3_ref,
               mask9_ref, o_ref):
        x = x_ref[...]                                               # (c_in, L) bf16

        # ---- conv1: 1x1 conv (BN scale pre-folded into w1) + bias + LeakyReLU ----
        t1 = jnp.dot(w1_ref[...], x, preferred_element_type=jnp.float32)
        t1 = leaky(t1 + b1_ref[...])                                 # (c_mid, L) f32

        # ---- conv2: 3x3 pad=1 as ONE wide-K matmul over 9 lane-rolled taps ----
        taps = []
        for dh in (-1, 0, 1):
            for dw in (-1, 0, 1):
                shift = dh * W + dw                                  # neighbor offset
                if shift == 0:
                    taps.append(t1)
                else:
                    # src[p] = t1[p + shift]  (lane rotation, XLU slot)
                    taps.append(pltpu.roll(t1, shift=(-shift) % L, axis=1))
        src9 = jnp.concatenate(taps, axis=0)                         # (9*c_mid, L)
        # single-pass zero-padding mask (precomputed constant), then bf16 for the MXU
        src9 = (src9 * mask9_ref[...]).astype(jnp.bfloat16)
        t2 = jnp.dot(w2_ref[...], src9, preferred_element_type=jnp.float32)
        t2 = leaky(t2 + b2_ref[...])                                 # (c_in, L) f32

        # ---- conv3: 1x1 conv + bias + LeakyReLU ----
        t3 = jnp.dot(w3_ref[...], t2.astype(jnp.bfloat16),
                     preferred_element_type=jnp.float32)
        o_ref[...] = leaky(t3 + b3_ref[...]).astype(o_ref.dtype)     # (c_out, L)

    return kernel


def cnn_block_forward(x_nchw, params, *, max_batch_block=8):
    """Pallas forward of CNNBlock. x_nchw: (N, C_in, H, W). Weights in PyTorch OIHW."""
    N, c_in, H, W = x_nchw.shape
    HW = H * W
    w1, bn1 = params["w1"], params["bn1"]        # (c_mid, c_in, 1, 1)
    w2, bn2 = params["w2"], params["bn2"]        # (c_in, c_mid, 3, 3)
    w3, bn3 = params["w3"], params["bn3"]        # (c_out, c_in, 1, 1)
    c_mid, c_out = w1.shape[0], w3.shape[0]

    nb = _pick_batch_block(N, max_batch_block)
    n_steps = N // nb
    L = nb * HW                                  # lanes per grid step

    # ---- fold BN scale into conv weights (trace-time, tiny tensors); keep bias ----
    s1, b1 = _fold_bn(*bn1)
    s2, b2 = _fold_bn(*bn2)
    s3, b3 = _fold_bn(*bn3)
    w1f = (w1[:, :, 0, 0] * s1[:, None]).astype(jnp.bfloat16)            # (c_mid, c_in)
    # (c_in, c_mid, 3, 3) -> (c_in, 3, 3, c_mid) -> (c_in, 9*c_mid); row-scale by s2
    w2f = (jnp.transpose(w2, (0, 2, 3, 1)).reshape(c_in, 9 * c_mid)
           * s2[:, None]).astype(jnp.bfloat16)                           # (c_in, 9*c_mid)
    w3f = (w3[:, :, 0, 0] * s3[:, None]).astype(jnp.bfloat16)            # (c_out, c_in)
    b1 = b1.reshape(c_mid, 1).astype(jnp.float32)
    b2 = b2.reshape(c_in, 1).astype(jnp.float32)
    b3 = b3.reshape(c_out, 1).astype(jnp.float32)

    # ---- lane-dense layout: channels on sublanes, batch*pixels on lanes ----
    x2d = jnp.transpose(x_nchw.reshape(N, c_in, HW), (1, 0, 2)).reshape(c_in, N * HW)
    x2d = x2d.astype(jnp.bfloat16)               # half the HBM->VMEM DMA bytes

    # ---- precomputed zero-padding masks for the 9 taps (constants of H, W) ----
    pix = jnp.arange(L)
    hh = (pix % HW) // W
    ww = pix % W
    tap_masks = []
    for dh in (-1, 0, 1):
        for dw in (-1, 0, 1):
            valid = jnp.ones((L,), jnp.bool_)
            if dh < 0:
                valid = valid & (hh >= -dh)
            if dh > 0:
                valid = valid & (hh < H - dh)
            if dw < 0:
                valid = valid & (ww >= -dw)
            if dw > 0:
                valid = valid & (ww < W - dw)
            tap_masks.append(valid)
    mask9 = jnp.repeat(jnp.stack(tap_masks, axis=0).astype(jnp.float32),
                       c_mid, axis=0)            # (9*c_mid, L), tap-major rows

    kernel = _make_cnn_block_kernel(W, L, NEG_SLOPE)

    flops = 2 * N * HW * (c_in * c_mid + 9 * c_mid * c_in + c_in * c_out)
    # Advisory only: weights/masks counted once even though nominally re-fetched.
    bytes_accessed = (x2d.size * 2 + N * HW * c_out * 4
                      + (w1f.size + w2f.size + w3f.size) * 2
                      + (b1.size + b2.size + b3.size) * 4
                      + mask9.size * 4)

    grid_spec = pltpu.PrefetchScalarGridSpec(
        num_scalar_prefetch=0,
        grid=(n_steps,),
        in_specs=[
            pl.BlockSpec((c_in, L), lambda g: (0, g)),              # x (batch block)
            pl.BlockSpec((c_mid, c_in), lambda g: (0, 0)),          # w1 (scale folded)
            pl.BlockSpec((c_mid, 1), lambda g: (0, 0)),             # b1
            pl.BlockSpec((c_in, 9 * c_mid), lambda g: (0, 0)),      # w2 (scale folded)
            pl.BlockSpec((c_in, 1), lambda g: (0, 0)),              # b2
            pl.BlockSpec((c_out, c_in), lambda g: (0, 0)),          # w3 (scale folded)
            pl.BlockSpec((c_out, 1), lambda g: (0, 0)),             # b3
            pl.BlockSpec((9 * c_mid, L), lambda g: (0, 0)),         # padding masks
        ],
        out_specs=pl.BlockSpec((c_out, L), lambda g: (0, g)),
    )

    out2d = pl.pallas_call(
        kernel,
        out_shape=jax.ShapeDtypeStruct((c_out, N * HW), jnp.float32),
        grid_spec=grid_spec,
        compiler_params=pltpu.CompilerParams(dimension_semantics=("parallel",)),
        cost_estimate=pl.CostEstimate(flops=flops, transcendentals=0,
                                      bytes_accessed=bytes_accessed),
    )(x2d, w1f, b1, w2f, b2, w3f, b3, mask9)

    out = out2d.reshape(c_out, N, HW)
    return jnp.transpose(out, (1, 0, 2)).reshape(N, c_out, H, W)


# ---------------- pure-JAX reference (matches PyTorch eval-mode forward) -------------
def _ref_conv_bn_leaky(x, w, bn, padding):
    gamma, beta, mean, var = bn
    y = lax.conv_general_dilated(
        x, w, window_strides=(1, 1),
        padding=[(padding, padding), (padding, padding)],
        dimension_numbers=("NCHW", "OIHW", "NCHW"))
    scale = gamma / jnp.sqrt(var + BN_EPS)
    bias = beta - mean * scale
    y = y * scale[None, :, None, None] + bias[None, :, None, None]
    return jnp.where(y >= 0, y, NEG_SLOPE * y)


def cnn_block_ref(x, params):
    y = _ref_conv_bn_leaky(x, params["w1"], params["bn1"], 0)
    y = _ref_conv_bn_leaky(y, params["w2"], params["bn2"], 1)
    y = _ref_conv_bn_leaky(y, params["w3"], params["bn3"], 0)
    return y


if __name__ == "__main__":
    key = jax.random.PRNGKey(0)
    ks = jax.random.split(key, 8)

    N, c_in, H, W = 2, 8, 16, 16
    c_out = 16
    c_mid = c_in // 2

    def make_bn(k, c):
        k1, k2, k3, k4 = jax.random.split(k, 4)
        gamma = jax.random.uniform(k1, (c,), minval=0.5, maxval=1.5).astype(jnp.float32)
        beta = (0.1 * jax.random.normal(k2, (c,))).astype(jnp.float32)
        mean = (0.1 * jax.random.normal(k3, (c,))).astype(jnp.float32)
        var = jax.random.uniform(k4, (c,), minval=0.5, maxval=1.5).astype(jnp.float32)
        return (gamma, beta, mean, var)

    x = jax.random.normal(ks[0], (N, c_in, H, W), dtype=jnp.float32)
    params = {
        "w1": jax.random.normal(ks[1], (c_mid, c_in, 1, 1), jnp.float32) / jnp.sqrt(c_in),
        "bn1": make_bn(ks[2], c_mid),
        "w2": jax.random.normal(ks[3], (c_in, c_mid, 3, 3), jnp.float32) / jnp.sqrt(9 * c_mid),
        "bn2": make_bn(ks[4], c_in),
        "w3": jax.random.normal(ks[5], (c_out, c_in, 1, 1), jnp.float32) / jnp.sqrt(c_in),
        "bn3": make_bn(ks[6], c_out),
    }

    out = cnn_block_forward(x, params)
    out = jax.block_until_ready(out)

    ref = cnn_block_ref(x, params)
    assert out.shape == (N, c_out, H, W), out.shape
    max_err = float(jnp.max(jnp.abs(out - ref)))
    # bf16 MXU inputs (f32 accumulation) => small deviation from the f32 reference.
    assert jnp.allclose(out, ref, atol=5e-2, rtol=5e-2), max_err

    print("KERNEL_OK")
</pallas_src>

<mosaic_0001>
module attributes {stable_mosaic.version = 11 : i64} {
  func.func @kernel(%arg0: i32, %arg1: memref<8x256xbf16, #tpu.memory_space<vmem>>, %arg2: memref<4x8xbf16, #tpu.memory_space<vmem>>, %arg3: memref<4x1xf32, #tpu.memory_space<vmem>>, %arg4: memref<8x36xbf16, #tpu.memory_space<vmem>>, %arg5: memref<8x1xf32, #tpu.memory_space<vmem>>, %arg6: memref<16x8xbf16, #tpu.memory_space<vmem>>, %arg7: memref<16x1xf32, #tpu.memory_space<vmem>>, %arg8: memref<36x256xf32, #tpu.memory_space<vmem>>, %arg9: memref<16x256xf32, #tpu.memory_space<vmem>>) attributes {dimension_semantics = [#tpu.dimension_semantics<parallel>], iteration_bounds = array<i64: 2>, scalar_prefetch = 0 : i64, scratch_operands = 0 : i64, tpu.core_type = #tpu.core_type<tc>, window_params = [{transform_indices = @transform_0, window_bounds = array<i64: 8, 256>}, {pipeline_mode = #tpu.pipeline_mode<synchronous>, transform_indices = @transform_1, window_bounds = array<i64: 4, 8>}, {pipeline_mode = #tpu.pipeline_mode<synchronous>, transform_indices = @transform_2, window_bounds = array<i64: 4, 1>}, {pipeline_mode = #tpu.pipeline_mode<synchronous>, transform_indices = @transform_3, window_bounds = array<i64: 8, 36>}, {pipeline_mode = #tpu.pipeline_mode<synchronous>, transform_indices = @transform_4, window_bounds = array<i64: 8, 1>}, {pipeline_mode = #tpu.pipeline_mode<synchronous>, transform_indices = @transform_5, window_bounds = array<i64: 16, 8>}, {pipeline_mode = #tpu.pipeline_mode<synchronous>, transform_indices = @transform_6, window_bounds = array<i64: 16, 1>}, {pipeline_mode = #tpu.pipeline_mode<synchronous>, transform_indices = @transform_7, window_bounds = array<i64: 36, 256>}, {transform_indices = @transform_8, window_bounds = array<i64: 16, 256>}]} {
    %c0 = arith.constant 0 : index
    %c0_0 = arith.constant 0 : index
    %0 = vector.load %arg1[%c0, %c0_0] : memref<8x256xbf16, #tpu.memory_space<vmem>>, vector<8x256xbf16>
    %c0_1 = arith.constant 0 : index
    %c0_2 = arith.constant 0 : index
    %1 = vector.load %arg2[%c0_1, %c0_2] : memref<4x8xbf16, #tpu.memory_space<vmem>>, vector<4x8xbf16>
    %cst = arith.constant dense<0.000000e+00> : vector<4x256xf32>
    %2 = tpu.matmul %1, %0, %cst {dimension_numbers = #tpu.dot_dimension_numbers<[1], [0], [0], [1], [0, 0, 1, 1], [], []>} : vector<4x8xbf16>, vector<8x256xbf16>, vector<4x256xf32> -> vector<4x256xf32>
    %c0_3 = arith.constant 0 : index
    %c0_4 = arith.constant 0 : index
    %3 = vector.load %arg3[%c0_3, %c0_4] : memref<4x1xf32, #tpu.memory_space<vmem>>, vector<4x1xf32>
    %4 = vector.broadcast %3 : vector<4x1xf32> to vector<4x256xf32>
    %5 = arith.addf %2, %4 : vector<4x256xf32>
    %cst_5 = arith.constant 1.000000e-01 : f32
    %6 = vector.broadcast %cst_5 : f32 to vector<4x256xf32>
    %7 = arith.mulf %6, %5 : vector<4x256xf32>
    %8 = arith.maximumf %5, %7 : vector<4x256xf32>
    %c17_i32 = arith.constant 17 : i32
    %9 = tpu.dynamic_rotate %8 by %c17_i32 dim 1 : vector<4x256xf32>, i32 -> vector<4x256xf32>
    %c16_i32 = arith.constant 16 : i32
    %10 = tpu.dynamic_rotate %8 by %c16_i32 dim 1 : vector<4x256xf32>, i32 -> vector<4x256xf32>
    %c15_i32 = arith.constant 15 : i32
    %11 = tpu.dynamic_rotate %8 by %c15_i32 dim 1 : vector<4x256xf32>, i32 -> vector<4x256xf32>
    %c1_i32 = arith.constant 1 : i32
    %12 = tpu.dynamic_rotate %8 by %c1_i32 dim 1 : vector<4x256xf32>, i32 -> vector<4x256xf32>
    %c255_i32 = arith.constant 255 : i32
    %13 = tpu.dynamic_rotate %8 by %c255_i32 dim 1 : vector<4x256xf32>, i32 -> vector<4x256xf32>
    %c241_i32 = arith.constant 241 : i32
    %14 = tpu.dynamic_rotate %8 by %c241_i32 dim 1 : vector<4x256xf32>, i32 -> vector<4x256xf32>
    %c240_i32 = arith.constant 240 : i32
    %15 = tpu.dynamic_rotate %8 by %c240_i32 dim 1 : vector<4x256xf32>, i32 -> vector<4x256xf32>
    %c239_i32 = arith.constant 239 : i32
    %16 = tpu.dynamic_rotate %8 by %c239_i32 dim 1 : vector<4x256xf32>, i32 -> vector<4x256xf32>
    %17 = tpu.concatenate %9, %10, %11, %12, %8, %13, %14, %15, %16 in 0 : vector<4x256xf32>, vector<4x256xf32>, vector<4x256xf32>, vector<4x256xf32>, vector<4x256xf32>, vector<4x256xf32>, vector<4x256xf32>, vector<4x256xf32>, vector<4x256xf32> -> vector<36x256xf32>
    %c0_6 = arith.constant 0 : index
    %c0_7 = arith.constant 0 : index
    %18 = vector.load %arg8[%c0_6, %c0_7] : memref<36x256xf32, #tpu.memory_space<vmem>>, vector<36x256xf32>
    %19 = arith.mulf %17, %18 : vector<36x256xf32>
    %20 = arith.truncf %19 : vector<36x256xf32> to vector<36x256xbf16>
    %c0_8 = arith.constant 0 : index
    %c0_9 = arith.constant 0 : index
    %21 = vector.load %arg4[%c0_8, %c0_9] : memref<8x36xbf16, #tpu.memory_space<vmem>>, vector<8x36xbf16>
    %cst_10 = arith.constant dense<0.000000e+00> : vector<8x256xf32>
    %22 = tpu.matmul %21, %20, %cst_10 {dimension_numbers = #tpu.dot_dimension_numbers<[1], [0], [0], [1], [0, 0, 1, 1], [], []>} : vector<8x36xbf16>, vector<36x256xbf16>, vector<8x256xf32> -> vector<8x256xf32>
    %c0_11 = arith.constant 0 : index
    %c0_12 = arith.constant 0 : index
    %23 = vector.load %arg5[%c0_11, %c0_12] : memref<8x1xf32, #tpu.memory_space<vmem>>, vector<8x1xf32>
    %24 = vector.broadcast %23 : vector<8x1xf32> to vector<8x256xf32>
    %25 = arith.addf %22, %24 : vector<8x256xf32>
    %cst_13 = arith.constant 1.000000e-01 : f32
    %26 = vector.broadcast %cst_13 : f32 to vector<8x256xf32>
    %27 = arith.mulf %26, %25 : vector<8x256xf32>
    %28 = arith.maximumf %25, %27 : vector<8x256xf32>
    %c0_14 = arith.constant 0 : index
    %c0_15 = arith.constant 0 : index
    %29 = vector.load %arg6[%c0_14, %c0_15] : memref<16x8xbf16, #tpu.memory_space<vmem>>, vector<16x8xbf16>
    %30 = arith.truncf %28 : vector<8x256xf32> to vector<8x256xbf16>
    %cst_16 = arith.constant dense<0.000000e+00> : vector<16x256xf32>
    %31 = tpu.matmul %29, %30, %cst_16 {dimension_numbers = #tpu.dot_dimension_numbers<[1], [0], [0], [1], [0, 0, 1, 1], [], []>} : vector<16x8xbf16>, vector<8x256xbf16>, vector<16x256xf32> -> vector<16x256xf32>
    %c0_17 = arith.constant 0 : index
    %c0_18 = arith.constant 0 : index
    %32 = vector.load %arg7[%c0_17, %c0_18] : memref<16x1xf32, #tpu.memory_space<vmem>>, vector<16x1xf32>
    %33 = vector.broadcast %32 : vector<16x1xf32> to vector<16x256xf32>
    %34 = arith.addf %31, %33 : vector<16x256xf32>
    %cst_19 = arith.constant 1.000000e-01 : f32
    %35 = vector.broadcast %cst_19 : f32 to vector<16x256xf32>
    %36 = arith.mulf %35, %34 : vector<16x256xf32>
    %37 = arith.maximumf %34, %36 : vector<16x256xf32>
    %c0_20 = arith.constant 0 : index
    %c0_21 = arith.constant 0 : index
    %38 = vector.load %arg9[%c0_20, %c0_21] : memref<16x256xf32, #tpu.memory_space<vmem>>, vector<16x256xf32>
    tpu.vector_store %arg9[%c0_20, %c0_21], %37 {strides = array<i32>} : memref<16x256xf32, #tpu.memory_space<vmem>>, vector<16x256xf32>,
    return
  }
  func.func @transform_0(%arg0: i32) -> (i32, i32) {
    %c0_i32 = arith.constant 0 : i32
    %c0_i32_0 = arith.constant 0 : i32
    return %c0_i32, %arg0 : i32, i32
  }
  func.func @transform_1(%arg0: i32) -> (i32, i32) {
    %c0_i32 = arith.constant 0 : i32
    %c0_i32_0 = arith.constant 0 : i32
    %c0_i32_1 = arith.constant 0 : i32
    return %c0_i32, %c0_i32_0 : i32, i32
  }
  func.func @transform_2(%arg0: i32) -> (i32, i32) {
    %c0_i32 = arith.constant 0 : i32
    %c0_i32_0 = arith.constant 0 : i32
    %c0_i32_1 = arith.constant 0 : i32
    return %c0_i32, %c0_i32_0 : i32, i32
  }
  func.func @transform_3(%arg0: i32) -> (i32, i32) {
    %c0_i32 = arith.constant 0 : i32
    %c0_i32_0 = arith.constant 0 : i32
    %c0_i32_1 = arith.constant 0 : i32
    return %c0_i32, %c0_i32_0 : i32, i32
  }
  func.func @transform_4(%arg0: i32) -> (i32, i32) {
    %c0_i32 = arith.constant 0 : i32
    %c0_i32_0 = arith.constant 0 : i32
    %c0_i32_1 = arith.constant 0 : i32
    return %c0_i32, %c0_i32_0 : i32, i32
  }
  func.func @transform_5(%arg0: i32) -> (i32, i32) {
    %c0_i32 = arith.constant 0 : i32
    %c0_i32_0 = arith.constant 0 : i32
    %c0_i32_1 = arith.constant 0 : i32
    return %c0_i32, %c0_i32_0 : i32, i32
  }
  func.func @transform_6(%arg0: i32) -> (i32, i32) {
    %c0_i32 = arith.constant 0 : i32
    %c0_i32_0 = arith.constant 0 : i32
    %c0_i32_1 = arith.constant 0 : i32
    return %c0_i32, %c0_i32_0 : i32, i32
  }
  func.func @transform_7(%arg0: i32) -> (i32, i32) {
    %c0_i32 = arith.constant 0 : i32
    %c0_i32_0 = arith.constant 0 : i32
    %c0_i32_1 = arith.constant 0 : i32
    return %c0_i32, %c0_i32_0 : i32, i32
  }
  func.func @transform_8(%arg0: i32) -> (i32, i32) {
    %c0_i32 = arith.constant 0 : i32
    %c0_i32_0 = arith.constant 0 : i32
    return %c0_i32, %arg0 : i32, i32
  }
}

</mosaic_0001>

<bundles_post_ra>
// kernel: tpu_custom_call.1
= control target key start
LH: loop header
LB: loop body
LE: loop exit
PB: predicated region body
PF: predicated region fallthrough
CT: control target
= control target key end

     0   :  { %13 = vsyncpa [#allocation3], 0  ;;  %s1203_s0 = inlined_call_operand.vmem [shape: bf16[8,512], index: 0, kind: input, shape index: {}]   ;;  %s1204_s1 = inlined_call_operand.vmem [shape: bf16[4,8], index: 1, kind: input, shape index: {}]   ;;  %s1205_s2 = inlined_call_operand.vmem [shape: f32[4,1], index: 2, kind: input, shape index: {}]   ;;  %s1206_s3 = inlined_call_operand.vmem [shape: bf16[8,36], index: 3, kind: input, shape index: {}]   ;;  %s1207_s4 = inlined_call_operand.vmem [shape: f32[8,1], index: 4, kind: input, shape index: {}]   ;;  %s1208_s5 = inlined_call_operand.vmem [shape: bf16[16,8], index: 5, kind: input, shape index: {}]   ;;  %s1209_s6 = inlined_call_operand.vmem [shape: f32[16,1], index: 6, kind: input, shape index: {}]   ;;  %s1210_s7 = inlined_call_operand.hbm [shape: f32[36,256], index: 7, kind: input, shape index: {}]   ;;  %s1211_s8 = inlined_call_operand.hbm [shape: f32[16,512], index: 8, kind: output, shape index: {}]  }
   0x1   :  { %14 = vsyncpa [#allocation4], 0 }
   0x2   :  { %16 = vsyncpa [#allocation4 + $0x1], 0  ;;  %s992_s27 = smov 0   ;;  %s994_s28 = smov 0  }
   0x3   :  { %s996_s29 = smov 0   ;;  %s998_s30 = smov 0  }
   0x4 LB: > { %s1013_s9 = sadd.s32 4294967295, %s930_s30   ;;  %s744_s10 = sadd.s32 4294967294, %s930_s30   ;;  %s930_s30 = sphi %s998_s30, %s1227_s30   ;;  %s926_s29 = sphi %s996_s29, %s1226_s29   ;;  %s922_s28 = sphi %s994_s28, %s1225_s28   ;;  %s918_s27 = sphi %s992_s27, %s1224_s27  }
   0x5   : > { %s1017_s11 = sadd.s32 1, %s930_s30   ;;  %s202_s12 = sadd.s32 1, %s926_s29 }
   0x6   : > { %s199_s13 = ssub.s32 %s930_s30, %s1017_s11  ;;  %p212_p0 = scmp.ne.s32.totalorder %s926_s29, %s922_s28 }
   0x7   : > { %p200_p1 = scmp.eq.s32.totalorder %s199_s13, 0  ;;  %p213_p2 = scmp.eq.s32.totalorder %s1013_s9, 1 }
   0x8   : > { %p218_p3 = scmp.ne.s32.totalorder %s922_s28, %s918_s27  ;;  %p219_p4 = scmp.eq.s32.totalorder %s744_s10, 1 }
   0x9   : > { %s1028_s14 = scalar_select %p200_p1, %s926_s29, %s202_s12  }
   0xa   : > { %p1030_p5 = por %p213_p2, %p212_p0  ;;  %p1034_p6 = por %p219_p4, %p218_p3 }
   0xb   : > { %p745_p7 = scmp.ge.s32.totalorder %s930_s30, 1  ;;  %p226_p8 = scmp.lt.s32.totalorder %s930_s30, 3 }
   0xc   : > { %s1215_s15 = scalar_select %p1030_p5, 1, 0 }
   0xd   : > { %s1216_s16 = scalar_select %p1034_p6, 1, 0 }
   0xe   : > { %p1212_p9 = scmp.eq.s32.totalorder %s1013_s9, 0  ;;  %p1041_p10 = pnand %p745_p7, %p226_p8 }
   0xf   : > { %s932_s18 = smov [#allocation2]   ;;  %s836_s23 = scalar_lea.hbm %s1210_s7, 1280 }
  0x10   : > { %s1217_s17 = scalar_select %p1041_p10, 1, 0 }
  0x11   : > { %s256_s19 = sshll.u32 %s932_s18, 4  ;;  %p774_p11 = pneg %p1041_p10  ;;  %s257_s19 = int_to_ptr.vmem [resolvable:$true] %s256_s19 }
  0x12   : > { %p837_p13 = scmp.ne.s32.totalorder %s1210_s7, %s836_s23  ;;  %p843_p3 = scmp.lt.u32.totalorder %s836_s23, %s1210_s7 }
  0x13   : > { %p1049_p12 = pnand %p1212_p9, %p774_p11 }
  0x15   : > { %p838_p0 = pneg %p1049_p12 }
  0x17   : > { %p839_p1 = pnand %p838_p0, %p837_p13 }
  0x19   : > { %p840_p2 = pneg %p839_p1 }
  0x1b   : > { %p845_p4 = pnand %p843_p3, %p840_p2 }
  0x1d   : > { %848 = shalt.err (!%p845_p4)
}
  0x1e   : > { %s849_s12 = scalar_lea.vmem %s257_s19, 1280  ;;  %p857_p9 = scmp.lt.s32.totalorder %s257_s19, %s257_s19 }
  0x1f   : > { %p850_p7 = scmp.ne.s32.totalorder %s257_s19, %s849_s12  ;;  %p858_p6 = scmp.lt.s32.totalorder %s849_s12, %s849_s12 }
  0x21   : > { %p852_p8 = pnand %p850_p7, %p838_p0  ;;  %p859_p5 = por %p858_p6, %p857_p9 }
  0x23   : > { %p853_p11 = pneg %p852_p8 }
  0x25   : > { %p860_p10 = pnand %p859_p5, %p853_p11 }
  0x27   : > { %863 = shalt.err (!%p860_p10)
}
  0x28   : > { %s933_s13 = smov 256   ;;  %s934_s18 = smov 16  }
  0x29   : > { %777 = dma.hbm_to_vmem [thread:$0]  (!%p1049_p12), %s1210_s7, 1280, %s257_s19, [#allocation3], %s933_s13, %s933_s13, %s934_s18  }
  0x2a   : > { %p1219_p13 = scmp.ne.s32.totalorder %s1217_s17, 0 }
  0x2b   : > { %p1220_p1 = scmp.eq.s32.totalorder (!%p1219_p13), %s1013_s9, 0 }
  0x2c   : > { %281 = sbr.rel (%p1219_p13) target bundleno = 897 (0x381), region = 52 }
  0x33   : > { %909 = dma.done.wait (%p1220_p1), [#allocation3], 1280   ;;  %p1221_p0 = pmov %p1220_p1 }
  0x34   : > { %s751_s23 = sshll.u32 %s1013_s9, 1  ;;  %v935_v0 = vmov 0   ;;  %vm340_vm0 = vcmask 1043456   ;;  %v325_v2 = vld [vmem:[%s1205_s2] sm:$0xf]  ;;  %vm336_vm1 = vcmask 64512   ;;  %v396_v23 = vlaneseq }
  0x35   : > { %911 = vsyncadd (%p1221_p0), [#allocation3], 4294966016  ;;  %p316_p5 = scmp.lt.s32.totalorder %s751_s23, 3  ;;  %379 = vmatprep.mubr.bf16.mxu0 %v935_v0  ;;  %831 = vset.pattern.permute.xlu0 %v935_v0  ;;  %v324_v6 = vld [vmem:[%s1204_s1] sm:$0x3]  ;;  %s936_s13 = smov 1  }
  0x36   : > { %558 = vmatprep.mubr.bf16.mxu1 %v935_v0  ;;  %832 = vset.pattern.permute.xlu1 %v935_v0  ;;  %s937_s18 = smov 16   ;;  %s938_s21 = smov 17   ;;  %v575_v18 = vld [vmem:[%s1209_s6] sm:$0xff]  ;;  %v576_v20 = vld [vmem:[%s1209_s6 + $0x8] sm:$0xff]  ;;  %v1119_v25 = vand.u32 127, %v396_v23  ;;  %v485_v41 = vld [vmem:[#allocation2 + $0x18] sm:$0xff] }
  0x37   : > { %s1229_s23 = smov (!%p316_p5, %s751_s23), 3  ;;  %328 = vperm.xlu0 %831, %v325_v2   ;;  %s939_s22 = smov 15   ;;  %v509_v19 = vld [vmem:[%s1207_s4] sm:$0xff]  ;;  %v484_v42 = vld [vmem:[#allocation2 + $0x10] sm:$0xff]  ;;  %v483_v49 = vld [vmem:[#allocation2 + $0x8] sm:$0xff]  ;;  %vm519_vm10 = vcmask 1041408  }
  0x38   : > { %s752_s20 = sshll.u32 %s1229_s23, 2  ;;  %s940_s23 = smov 127   ;;  %vm419_vm2 = vcmp.lt.s32.totalorder %v1119_v25, 1  ;;  %vm412_vm3 = vcmp.lt.s32.totalorder %v1119_v25, 15  ;;  %vm405_vm4 = vcmp.lt.s32.totalorder %v1119_v25, 16  ;;  %vm426_vm5 = vcmp.lt.s32.totalorder %v1119_v25, 127 }
  0x39   : > { %s319_s17 = scalar_lea.vmem %s1203_s0, %s752_s20  ;;  %s941_s20 = smov 112   ;;  %vm398_vm6 = vcmp.lt.s32.totalorder %v1119_v25, 17  ;;  %vm440_vm7 = vcmp.lt.s32.totalorder %v1119_v25, 112  ;;  %v482_v50 = vld [vmem:[#allocation2] sm:$0xff]  ;;  %vm433_vm8 = vcmp.lt.s32.totalorder %v1119_v25, 113  ;;  %vm447_vm9 = vcmp.lt.s32.totalorder %v1119_v25, 111 }
  0x3a   : > { %v323_v1 = vld [vmem:[%s319_s17] sm:$0xff]  ;;  %s942_s19 = smov 113   ;;  %s943_s24 = smov 111   ;;  %vm515_vm11 = vcmask 293888  }
  0x3b   : > { %v754_v3 = vcombine.high %v323_v1, %v323_v1  ;;  %v753_v4 = vcombine.low %v323_v1, %v323_v1  ;;  %s767_s26 = sshll.u32 %s1013_s9, 8  ;;  %p1222_p9 = scmp.ne.s32.totalorder %s1215_s15, 0 }
  0x3d   : > { %755 = vmatprep.subr.msk.bf16.mxu0 %vm340_vm0, %v754_v3  ;;  %v342_v5 = vsel %vm340_vm0, %v753_v4, 0  ;;  %v487_v3 = vld [vmem:[#allocation2 + $0x28] sm:$0xff] }
  0x3e   : > { %348 = vmatpush1.bf16.msra.mxu0 %v342_v5 }
  0x41   : > { %756 = vmatmul.mubr.msk.bf16.vlgmr.msra.gmra.mrb[0].mxu0 %vm336_vm1, %v324_v6 }
  0x42   : > { %633 = vmatprep.mubr.bf16.mxu0 %v935_v0 }
  0xb6   : > { %v329_v7 = vpop.permute.xlu0 %328 }
 0x114   : > { %v381_v8 = vpop.f32.mrb[0].mxu0 }
 0x115   : > { %v382_v9 = vadd.f32 %v381_v8, %v329_v7  ;;  %v383_v10 = vpop.f32.mrb[1].mxu0 }
 0x116   : > { %v384_v11 = vadd.f32 %v383_v10, %v329_v7  ;;  %v385_v12 = vpop.f32.mrb[2].mxu0  ;;  %v489_v10 = vld [vmem:[#allocation2 + $0x38] sm:$0xff] }
 0x117   : > { %v388_v13 = vmul.f32 0.1, %v382_v9  ;;  %v386_v14 = vpop.f32.mrb[3].mxu0  ;;  %v486_v12 = vld [vmem:[#allocation2 + $0x20] sm:$0xff] }
 0x118   : > { %v389_v16 = vmul.f32 0.1, %v384_v11 }
 0x119   : > { %v1088_v15 = vmax.f32 %v382_v9, %v388_v13  ;;  %v488_v9 = vld [vmem:[#allocation2 + $0x30] sm:$0xff] }
 0x11a   : > { %v1093_v17 = vmax.f32 %v384_v11, %v389_v16 }
 0x11b   : > { %415 = vrot.lane.b32.xlu1 %v1088_v15, %s936_s13  ;;  %401 = vrot.lane.b32.xlu0 %v1088_v15, %s937_s18 }
 0x11f   : > { %392 = vrot.lane.b32.xlu1 %v1088_v15, %s938_s21  ;;  %417 = vrot.lane.b32.xlu0 %v1093_v17, %s936_s13  ;;  %s1159_s13 = scalar_lea.hbm %s1211_s8, %s767_s26 }
 0x123   : > { %408 = vrot.lane.b32.xlu1 %v1088_v15, %s939_s22  ;;  %394 = vrot.lane.b32.xlu0 %v1093_v17, %s938_s21 }
 0x127   : > { %422 = vrot.lane.b32.xlu1 %v1088_v15, %s940_s23  ;;  %410 = vrot.lane.b32.xlu0 %v1093_v17, %s939_s22  ;;  %s944_s22 = smov [#allocation5]  }
 0x12b   : > { %403 = vrot.lane.b32.xlu1 %v1093_v17, %s937_s18  ;;  %424 = vrot.lane.b32.xlu0 %v1093_v17, %s940_s23  ;;  %s868_s23 = sshll.u32 %s944_s22, 4  ;;  %s869_s23 = int_to_ptr.vmem [resolvable:$false] %s868_s23 }
 0x12f   : > { %436 = vrot.lane.b32.xlu1 %v1088_v15, %s941_s20  ;;  %438 = vrot.lane.b32.xlu0 %v1093_v17, %s941_s20  ;;  %s870_s20 = scalar_lea.vmem %s869_s23, 1024 }
 0x133   : > { %429 = vrot.lane.b32.xlu1 %v1088_v15, %s942_s19  ;;  %431 = vrot.lane.b32.xlu0 %v1093_v17, %s942_s19  ;;  %s312_s19 = sand.u32 1, %s922_s28  }
 0x134   : > { %s1161_s21 = scalar_lea.sflag [#allocation4], %s312_s19 }
 0x137   : > { %443 = vrot.lane.b32.xlu1 %v1088_v15, %s943_s24  ;;  %445 = vrot.lane.b32.xlu0 %v1093_v17, %s943_s24  ;;  %s750_s24 = sshll.u32 %s312_s19, 5 }
 0x138   : > { %s314_s17 = scalar_lea.vmem [#allocation5], %s750_s24 }
 0x139   : > { %s670_s25 = sshll.u32 %s314_s17, 4  ;;  %s1154_s25 = int_to_ptr.vmem [resolvable:$true] %s670_s25 }
 0x13a   : > { %s864_s9 = scalar_lea.vmem %s1154_s25, 512  ;;  %p871_p2 = scmp.lt.s32.totalorder %s1154_s25, %s869_s23 }
 0x13b   : > { %579 = vperm.xlu0 %831, %v575_v18   ;;  %512 = vperm.xlu1 %832, %v509_v19   ;;  %p865_p6 = scmp.ne.s32.totalorder %s1154_s25, %s864_s9  ;;  %p872_p3 = scmp.lt.s32.totalorder %s870_s20, %s864_s9 }
 0x13d   : > { %p866_p10 = pnand %p865_p6, %p1222_p9  ;;  %p873_p4 = por %p872_p3, %p871_p2 }
 0x13f   : > { %584 = vperm.xlu1 %832, %v576_v20   ;;  %v491_v20 = vld [vmem:[#allocation2 + $0x48] sm:$0xf]  ;;  %p867_p12 = pneg %p866_p10 }
 0x141   : > { %p874_p7 = pnand %p873_p4, %p867_p12 }
 0x18d   : > { %v416_v21 = vpop.permute.xlu1 %415  ;;  %v402_v22 = vpop.permute.xlu0 %401 }
 0x191   : > { %v393_v24 = vpop.permute.xlu1 %392  ;;  %v418_v26 = vpop.permute.xlu0 %417 }
 0x192   : > { %v420_v29 = vsel %vm419_vm2, %v416_v21, %v418_v26  ;;  %v421_v30 = vsel %vm419_vm2, %v418_v26, %v416_v21 }
 0x193   : > { %v458_v35 = vrot.slane %v421_v30, 4  ;;  %v459_v36 = vrot.slane %v420_v29, 4 }
 0x195   : > { %v409_v27 = vpop.permute.xlu1 %408  ;;  %v395_v28 = vpop.permute.xlu0 %394 }
 0x196   : > { %v399_v51 = vsel %vm398_vm6, %v393_v24, %v395_v28  ;;  %v400_v52 = vsel %vm398_vm6, %v395_v28, %v393_v24 }
 0x199   : > { %v423_v31 = vpop.permute.xlu1 %422  ;;  %v411_v32 = vpop.permute.xlu0 %410 }
 0x19a   : > { %v413_v33 = vsel %vm412_vm3, %v409_v27, %v411_v32  ;;  %v414_v34 = vsel %vm412_vm3, %v411_v32, %v409_v27 }
 0x19b   : > { %v476_v37 = vsel %vm340_vm0, %v414_v34, %v458_v35  ;;  %v477_v40 = vsel %vm340_vm0, %v413_v33, %v459_v36  ;;  %v508_v34 = vld [vmem:[%s1206_s3] sm:$0xf] }
 0x19c   : > { %v495_v53 = vmul.f32 %v485_v41, %v477_v40  ;;  %v494_v54 = vmul.f32 %v484_v42, %v476_v37 }
 0x19d   : > { %v404_v38 = vpop.permute.xlu1 %403  ;;  %v425_v39 = vpop.permute.xlu0 %424 }
 0x19e   : > { %v406_v43 = vsel %vm405_vm4, %v402_v22, %v404_v38  ;;  %v407_v44 = vsel %vm405_vm4, %v404_v38, %v402_v22  ;;  %v427_v45 = vsel %vm426_vm5, %v423_v31, %v425_v39  ;;  %v428_v46 = vsel %vm426_vm5, %v425_v39, %v423_v31 }
 0x19f   : > { %v452_v47 = vrot.slane %v407_v44, 4  ;;  %v453_v48 = vrot.slane %v406_v43, 4  ;;  %v464_v55 = vrot.slane %v427_v45, 4  ;;  %v465_v56 = vrot.slane %v428_v46, 4 }
 0x1a1   : > { %v437_v57 = vpop.permute.xlu1 %436  ;;  %v439_v58 = vpop.permute.xlu0 %438  ;;  %v475_v59 = vsel %vm340_vm0, %v399_v51, %v453_v48  ;;  %v474_v60 = vsel %vm340_vm0, %v400_v52, %v452_v47  ;;  %v478_v4 = vsel %vm340_vm0, %v1088_v15, %v464_v55  ;;  %v479_v5 = vsel %vm340_vm0, %v1093_v17, %v465_v56  ;;  %v490_v17 = vld [vmem:[#allocation2 + $0x40] sm:$0xf] }
 0x1a2   : > { %v441_v61 = vsel %vm440_vm7, %v437_v57, %v439_v58  ;;  %v442_v62 = vsel %vm440_vm7, %v439_v58, %v437_v57  ;;  %v493_v63 = vmul.f32 %v483_v49, %v475_v59  ;;  %v492_v0 = vmul.f32 %v482_v50, %v474_v60  ;;  %v835_v49 = vld [vmem:[%s1208_s5] sm:$0xff]  }
 0x1a3   : > { %v470_v6 = vrot.slane %v441_v61, 4  ;;  %v471_v7 = vrot.slane %v442_v62, 4  ;;  %v497_v21 = vmul.f32 %v487_v3, %v479_v5  ;;  %v496_v22 = vmul.f32 %v486_v12, %v478_v4 }
 0x1a4   : > { %v503_v1 = vpack.c.bf16 %v495_v53, %v493_v63  ;;  %v502_v2 = vpack.c.bf16 %v494_v54, %v492_v0 }
 0x1a5   : > { %v430_v8 = vpop.permute.xlu1 %429  ;;  %v432_v11 = vpop.permute.xlu0 %431 }
 0x1a6   : > { %v434_v13 = vsel %vm433_vm8, %v430_v8, %v432_v11  ;;  %v435_v14 = vsel %vm433_vm8, %v432_v11, %v430_v8  ;;  %526 = vmatprep.subr.bf16.mxu1 %v503_v1 }
 0x1a7   : > { %v480_v16 = vsel %vm340_vm0, %v434_v13, %v470_v6  ;;  %v481_v18 = vsel %vm340_vm0, %v435_v14, %v471_v7  ;;  %527 = vmatpush1.bf16.msra.mxu1 %v502_v2 }
 0x1a8   : > { %v498_v15 = vmul.f32 %v488_v9, %v480_v16  ;;  %v499_v19 = vmul.f32 %v489_v10, %v481_v18 }
 0x1a9   : > { %v444_v23 = vpop.permute.xlu1 %443  ;;  %v446_v24 = vpop.permute.xlu0 %445 }
 0x1aa   : > { %v448_v26 = vsel %vm447_vm9, %v444_v23, %v446_v24  ;;  %v449_v27 = vsel %vm447_vm9, %v446_v24, %v444_v23  ;;  %v505_v28 = vpack.c.bf16 %v499_v19, %v497_v21  ;;  %v504_v29 = vpack.c.bf16 %v498_v15, %v496_v22 }
 0x1ab   : > { %v500_v30 = vmul.f32 %v490_v17, %v448_v26  ;;  %v501_v31 = vmul.f32 %v491_v20, %v449_v27 }
 0x1ac   : > { %528 = vmatprep.subr.bf16.mxu1 %v505_v28 }
 0x1ad   : > { %v506_v32 = vpack.c.bf16 %v500_v30, %v500_v30  ;;  %v507_v33 = vpack.c.bf16 %v501_v31, %v501_v31  ;;  %529 = vmatpush1.bf16.msra.mxu1 %v504_v29 }
 0x1af   : > { %757 = vmatprep.subr.msk.bf16.mxu1 %vm519_vm10, %v507_v33  ;;  %v521_v25 = vsel %vm519_vm10, %v506_v32, 0 }
 0x1b1   : > { %531 = vmatpush1.bf16.msra.mxu1 %v521_v25 }
 0x1b4   : > { %758 = vmatmul.mubr.msk.bf16.vlgmr.msra.gmra.mrb[0].mxu1 %vm515_vm11, %v508_v34 }
 0x1ba   : > { %v513_v35 = vpop.permute.xlu1 %512  ;;  %v580_v50 = vpop.permute.xlu0 %579 }
 0x1be   : > { %v585_v54 = vpop.permute.xlu1 %584 }
 0x287   : > { %v560_v36 = vpop.f32.mrb[0].mxu1 }
 0x288   : > { %v561_v37 = vadd.f32 %v560_v36, %v513_v35  ;;  %v562_v38 = vpop.f32.mrb[1].mxu1 }
 0x289   : > { %v563_v39 = vadd.f32 %v562_v38, %v513_v35  ;;  %v564_v40 = vpop.f32.mrb[2].mxu1 }
 0x28a   : > { %v567_v41 = vmul.f32 0.1, %v561_v37  ;;  %v565_v42 = vpop.f32.mrb[3].mxu1 }
 0x28b   : > { %v568_v43 = vmul.f32 0.1, %v563_v39 }
 0x28c   : > { %v569_v44 = vmax.f32 %v561_v37, %v567_v41 }
 0x28d   : > { %v570_v45 = vmax.f32 %v563_v39, %v568_v43 }
 0x28e   : > { %v573_v46 = vpack.c.bf16 %v569_v44, %v569_v44 }
 0x28f   : > { %v574_v47 = vpack.c.bf16 %v570_v45, %v570_v45 }
 0x290   : > { %v596_v48 = vsel %vm340_vm0, %v573_v46, 0 }
 0x291   : > { %760 = vmatprep.subr.msk.bf16.mxu0 %vm340_vm0, %v574_v47 }
 0x292   : > { %602 = vmatpush1.bf16.msra.mxu0 %v596_v48 }
 0x295   : > { %761 = vmatmul.mubr.msk.bf16.vlgmr.msra.gmra.mrb[4].mxu0 %vm336_vm1, %v835_v49 }
 0x368   : > { %v635_v51 = vpop.f32.mrb[4].mxu0 }
 0x369   : > { %v636_v52 = vadd.f32 %v635_v51, %v580_v50  ;;  %v637_v53 = vpop.f32.mrb[5].mxu0 }
 0x36a   : > { %v638_v55 = vadd.f32 %v637_v53, %v580_v50  ;;  %v639_v56 = vpop.f32.mrb[6].mxu0 }
 0x36b   : > { %v644_v57 = vmul.f32 0.1, %v636_v52  ;;  %v640_v58 = vadd.f32 %v639_v56, %v585_v54  ;;  %v641_v59 = vpop.f32.mrb[7].mxu0 }
 0x36c   : > { %v645_v60 = vmul.f32 0.1, %v638_v55  ;;  %v642_v61 = vadd.f32 %v641_v59, %v585_v54 }
 0x36d   : > { %v648_v62 = vmax.f32 %v636_v52, %v644_v57  ;;  %v646_v63 = vmul.f32 0.1, %v640_v58 }
 0x36e   : > { %v649_v0 = vmax.f32 %v638_v55, %v645_v60  ;;  %v647_v1 = vmul.f32 0.1, %v642_v61 }
 0x36f   : > { %652 = vst [vmem:[%s314_s17] sm:$0xff] %v648_v62  ;;  %v650_v2 = vmax.f32 %v640_v58, %v646_v63 }
 0x370   : > { %653 = vst [vmem:[%s314_s17 + $0x8] sm:$0xff] %v649_v0  ;;  %v651_v3 = vmax.f32 %v642_v61, %v647_v1 }
 0x371   : > { %654 = vst [vmem:[%s314_s17 + $0x10] sm:$0xff] %v650_v2 }
 0x372   : > { %655 = vst [vmem:[%s314_s17 + $0x18] sm:$0xff] %v651_v3 }
 0x373   : > { %877 = shalt.err (!%p874_p7)
}
 0x374   : > { %s878_s19 = scalar_lea.hbm %s1159_s13, 512  ;;  %s882_s26 = scalar_lea.hbm %s1211_s8, 1024 }
 0x375   : > { %p879_p8 = scmp.ne.s32.totalorder %s1159_s13, %s878_s19  ;;  %p883_p1 = scmp.lt.u32.totalorder %s1159_s13, %s1211_s8 }
 0x376   : > { %p884_p0 = scmp.lt.u32.totalorder %s882_s26, %s878_s19  ;;  %p886_p6 = scmp.lt.u32.totalorder %s878_s19, %s1159_s13 }
 0x377   : > { %p880_p11 = pnand %p879_p8, %p1222_p9 }
 0x378   : > { %p885_p5 = por %p884_p0, %p883_p1 }
 0x379   : > { %p881_p13 = pneg %p880_p11 }
 0x37a   : > { %p887_p10 = por %p886_p6, %p885_p5 }
 0x37c   : > { %p888_p12 = pnand %p887_p10, %p881_p13 }
 0x37e   : > { %891 = shalt.err (!%p888_p12)
}
 0x37f   : > { %s945_s9 = smov 256   ;;  %s946_s22 = smov 512  }
 0x380   : > { %772 = dma.vmem_to_hbm [thread:$0]  (%p1222_p9), %s1154_s25, 512, %s1159_s13, %s1161_s21, %s945_s9, %s946_s22, %s937_s18  }
 0x381 PF: > { %p784_p2 = scmp.ge.s32.totalorder %s930_s30, 2  ;;  %s685_s23 = sand.u32 1, %s918_s27  }
 0x382   : > { %p1223_p3 = scmp.ne.s32.totalorder %s1216_s16, 0  ;;  %s686_s20 = scalar_lea.sflag [#allocation4], %s685_s23 }
 0x384   : > { %p779_p4 = pnand %p784_p2, %p1223_p3 }
 0x386   : > { %913 = dma.done.wait (!%p779_p4), %s686_s20, 512  }
 0x387   : > { %915 = vsyncadd (!%p779_p4), %s686_s20, 4294966784  ;;  %p19_p7 = scmp.ge.s32.totalorder %s1017_s11, 4   ;;  %s1224_s27 = smov %s922_s28 }
 0x388   : > { %s1225_s28 = smov %s926_s29  ;;  %s1226_s29 = smov %s1028_s14 }
 0x389   : > { %s1227_s30 = smov %s1017_s11  ;;  %21 = sbr.rel (!%p19_p7) target bundleno = 4 (0x4), region = 92 }
 0x390   :  { %691 = vsyncpa [#allocation3], 1 }
 0x391   :  { %693 = vsyncpa [#allocation3 + $0x1], 1 }
 0x392   :  { %694 = vsyncpa [#allocation4], 1 }
 0x393   :  { %696 = vsyncpa [#allocation4 + $0x1], 1 }

</bundles_post_ra>
